<compile_context>
chip_gen: v5e
topology: v5e:2x2
jax: 0.10.0
libtpu: 0.0.40
codegen_flags: <defaults>
</compile_context>

<pallas_src>
import functools

import jax
import jax.numpy as jnp
from jax import lax
from jax.experimental import pallas as pl
from jax.experimental.pallas import tpu as pltpu

LANE = 128
ACC_ROWS = 64                 # (64,128) f32 accumulator = 8 vregs -> 8 parallel add chains
MAX_TILE_ROWS = 8192          # 8192 x 128 f32 = 4 MiB per input block
MIN_KERNEL_ELEMS = 1 << 15    # below this the pallas_call fixed cost dominates
VMEM_LIMIT_BYTES = 32 * 1024 * 1024


def _round_up(x, m):
    return ((x + m - 1) // m) * m


def _num_tensorcores():
    """TensorCores one Pallas grid can be split across via a 'parallel' axis."""
    try:
        kind = jax.devices()[0].device_kind.lower()
    except Exception:
        return 1
    # v4 / v5p megacore and v7x expose 2 TensorCores per device; v5e/v6e have 1.
    if "v7" in kind or "v4" in kind or "v5p" in kind:
        return 2
    return 1


def _mse_partial_kernel(p_ref, t_ref, out_ref, acc_ref, *,
                        rows, tile_rows, blocks_per_core, total_blocks,
                        has_overhang):
    c = pl.program_id(0)   # "parallel" core axis
    i = pl.program_id(1)   # sequential reduction axis
    idx = c * blocks_per_core + i

    @pl.when(i == 0)
    def _():
        acc_ref[...] = jnp.zeros_like(acc_ref)

    def accumulate(mask_tail):
        d = p_ref[...].astype(jnp.float32) - t_ref[...].astype(jnp.float32)
        sq = d * d
        if mask_tail:
            # Zero rows past the end of the (rows, 128) slab (OOB garbage of a
            # partial last block).  Only emitted for the boundary step.
            row_start = idx * tile_rows
            rid = lax.broadcasted_iota(jnp.int32, sq.shape, 0) + row_start
            sq = jnp.where(rid < rows, sq, 0.0)
        # Fold the (tile_rows, 128) tile onto 8 accumulator vregs with pure
        # vreg adds; the single cross-lane reduce happens once at the end.
        acc_ref[...] += jnp.sum(sq.reshape(-1, ACC_ROWS, LANE), axis=0)

    ragged_last = (rows % tile_rows) != 0   # static Python bool
    if ragged_last:
        @pl.when(idx < total_blocks - 1)
        def _():
            accumulate(False)

        @pl.when(idx == total_blocks - 1)
        def _():
            accumulate(True)
    elif has_overhang:
        # Safety net: skip fully-duplicated clamped blocks (should not occur
        # with the tile-size selection below).
        @pl.when(idx < total_blocks)
        def _():
            accumulate(False)
    else:
        accumulate(False)

    @pl.when(i == pl.num_programs(1) - 1)
    def _():
        out_ref[0, 0] = jnp.sum(acc_ref[...])


def mse_loss_pallas(pred, target):
    assert pred.shape == target.shape, (pred.shape, target.shape)
    n_elems = int(pred.size)
    out_dtype = jnp.promote_types(pred.dtype, target.dtype)

    def xla_fallback():
        d = pred.astype(jnp.float32) - target.astype(jnp.float32)
        return jnp.mean(d * d).astype(out_dtype)

    # Tiny inputs: a fused XLA elementwise+reduce beats the pallas_call fixed
    # cost (custom-call scheduling + grid step overhead).
    if n_elems < MIN_KERNEL_ELEMS:
        return xla_fallback()

    # A lane-dense 2-D view needs n_elems % 128 == 0.  Manufacturing one
    # (pad / prefix slice) costs a full extra HBM copy of BOTH inputs, which
    # is strictly worse than XLA's single-pass fused mean for this rare case.
    if n_elems % LANE != 0:
        return xla_fallback()

    rows = n_elems // LANE
    p2 = pred.reshape(rows, LANE)
    t2 = target.reshape(rows, LANE)

    ncores = _num_tensorcores()
    blocks_per_core = max(1, pl.cdiv(pl.cdiv(rows, ncores), MAX_TILE_ROWS))
    grid_blocks = ncores * blocks_per_core
    # Multiple of ACC_ROWS so the in-kernel fold reshape is exact; chosen so
    # grid_blocks * tile_rows covers `rows` with at most one ragged tail block
    # (no fully-duplicated blocks on the parallel axis).
    tile_rows = min(MAX_TILE_ROWS,
                    _round_up(pl.cdiv(rows, grid_blocks), ACC_ROWS))
    total_blocks = pl.cdiv(rows, tile_rows)
    has_overhang = grid_blocks > total_blocks   # static safety net

    if has_overhang:
        def in_map(c, i):
            return (jnp.minimum(c * blocks_per_core + i, total_blocks - 1), 0)
    else:
        def in_map(c, i):
            return (c * blocks_per_core + i, 0)

    kernel = functools.partial(
        _mse_partial_kernel,
        rows=rows,
        tile_rows=tile_rows,
        blocks_per_core=blocks_per_core,
        total_blocks=total_blocks,
        has_overhang=has_overhang,
    )

    cost = pl.CostEstimate(
        flops=3 * n_elems,
        transcendentals=0,
        bytes_accessed=n_elems * (p2.dtype.itemsize + t2.dtype.itemsize)
        + ncores * 4,
    )

    partials = pl.pallas_call(
        kernel,
        out_shape=jax.ShapeDtypeStruct((ncores, 1), jnp.float32),
        grid_spec=pltpu.PrefetchScalarGridSpec(
            num_scalar_prefetch=0,
            grid=(ncores, blocks_per_core),
            in_specs=[
                pl.BlockSpec((tile_rows, LANE), in_map),
                pl.BlockSpec((tile_rows, LANE), in_map),
            ],
            out_specs=pl.BlockSpec(
                (1, 1), lambda c, i: (c, 0), memory_space=pltpu.SMEM
            ),
            scratch_shapes=[pltpu.VMEM((ACC_ROWS, LANE), jnp.float32)],
        ),
        compiler_params=pltpu.CompilerParams(
            dimension_semantics=("parallel", "arbitrary"),
            vmem_limit_bytes=VMEM_LIMIT_BYTES,
        ),
        cost_estimate=cost,
    )(p2, t2)

    mean = jnp.sum(partials) / jnp.float32(n_elems)
    return mean.astype(out_dtype)


def get_loss_forward(pred, target, trans_feat):
    # trans_feat is unused in the reference PyTorch module.
    del trans_feat
    return mse_loss_pallas(pred, target)


if __name__ == "__main__":
    key = jax.random.PRNGKey(0)
    keys = jax.random.split(key, 12)

    def ref_mse(p, t):
        d = p.astype(jnp.float32) - t.astype(jnp.float32)
        return jnp.mean(d * d)

    # Primary example: small segmentation-style prediction tensors (runs the
    # Pallas kernel: rows = 512, single block, no masking).
    pred = jax.random.normal(keys[0], (2, 256, 128), dtype=jnp.float32)
    target = jax.random.normal(keys[1], (2, 256, 128), dtype=jnp.float32)
    trans_feat = jax.random.normal(keys[2], (2, 64, 64), dtype=jnp.float32)
    loss = jax.block_until_ready(get_loss_forward(pred, target, trans_feat))
    r = ref_mse(pred, target)
    assert jnp.allclose(loss, r, rtol=1e-5, atol=1e-6), (loss, r)

    # (a) Tiny input -> fused-XLA fast path.
    pa = jax.random.normal(keys[3], (2, 16, 64), dtype=jnp.float32)
    ta = jax.random.normal(keys[4], (2, 16, 64), dtype=jnp.float32)
    la = jax.block_until_ready(get_loss_forward(pa, ta, None))
    ra = ref_mse(pa, ta)
    assert jnp.allclose(la, ra, rtol=1e-5, atol=1e-6), (la, ra)

    # (b) Multi-block reduction with a ragged (masked) last block: rows = 20000.
    pb = jax.random.normal(keys[5], (25, 800, 128), dtype=jnp.float32)
    tb = jax.random.normal(keys[6], (25, 800, 128), dtype=jnp.float32)
    lb = jax.block_until_ready(get_loss_forward(pb, tb, None))
    rb = ref_mse(pb, tb)
    assert jnp.allclose(lb, rb, rtol=1e-4, atol=1e-5), (lb, rb)

    # (c) Element count not a multiple of 128 -> single-pass XLA fallback.
    pc = jax.random.normal(keys[7], (3, 513, 127), dtype=jnp.float32)
    tc = jax.random.normal(keys[8], (3, 513, 127), dtype=jnp.float32)
    lc = jax.block_until_ready(get_loss_forward(pc, tc, None))
    rc = ref_mse(pc, tc)
    assert jnp.allclose(lc, rc, rtol=1e-4, atol=1e-5), (lc, rc)

    # (d) bf16 inputs streamed in native dtype, cast to f32 inside the kernel.
    pd = pred.astype(jnp.bfloat16)
    td = target.astype(jnp.bfloat16)
    ld = jax.block_until_ready(get_loss_forward(pd, td, None))
    rd = ref_mse(pd, td)
    assert ld.dtype == jnp.bfloat16, ld.dtype
    assert jnp.allclose(ld.astype(jnp.float32), rd, rtol=2e-2, atol=1e-3), (ld, rd)

    print("KERNEL_OK")
</pallas_src>

<mosaic_0001>
module attributes {stable_mosaic.version = 11 : i64} {
  func.func @_mse_partial_kernel(%arg0: i32, %arg1: i32, %arg2: memref<512x128xf32, #tpu.memory_space<vmem>>, %arg3: memref<512x128xf32, #tpu.memory_space<vmem>>, %arg4: memref<1x1xf32, #tpu.memory_space<smem>>, %arg5: memref<64x128xf32, #tpu.memory_space<vmem>>) attributes {dimension_semantics = [#tpu.dimension_semantics<parallel>, #tpu.dimension_semantics<arbitrary>], iteration_bounds = array<i64: 1, 1>, scalar_prefetch = 0 : i64, scratch_operands = 1 : i64, tpu.core_type = #tpu.core_type<tc>, window_params = [{transform_indices = @transform_0, window_bounds = array<i64: 512, 128>}, {transform_indices = @transform_1, window_bounds = array<i64: 512, 128>}, {transform_indices = @transform_2, window_bounds = array<i64: 1, 1>}]} {
    %c0_i32 = arith.constant 0 : i32
    %0 = arith.cmpi eq, %arg1, %c0_i32 : i32
    %1 = arith.extui %0 : i1 to i32
    %c0_i32_0 = arith.constant 0 : i32
    %2 = arith.cmpi ne, %1, %c0_i32_0 : i32
    scf.if %2 {
      %cst_10 = arith.constant 0.000000e+00 : f32
      %15 = vector.broadcast %cst_10 : f32 to vector<64x128xf32>
      %c0_11 = arith.constant 0 : index
      %c0_12 = arith.constant 0 : index
      %16 = vector.load %arg5[%c0_11, %c0_12] : memref<64x128xf32, #tpu.memory_space<vmem>>, vector<64x128xf32>
      tpu.vector_store %arg5[%c0_11, %c0_12], %15 {strides = array<i32>} : memref<64x128xf32, #tpu.memory_space<vmem>>, vector<64x128xf32>,
    } else {
    }
    %c0 = arith.constant 0 : index
    %c0_1 = arith.constant 0 : index
    %3 = vector.load %arg2[%c0, %c0_1] : memref<512x128xf32, #tpu.memory_space<vmem>>, vector<512x128xf32>
    %c0_2 = arith.constant 0 : index
    %c0_3 = arith.constant 0 : index
    %4 = vector.load %arg3[%c0_2, %c0_3] : memref<512x128xf32, #tpu.memory_space<vmem>>, vector<512x128xf32>
    %5 = arith.subf %3, %4 : vector<512x128xf32>
    %6 = arith.mulf %5, %5 : vector<512x128xf32>
    %c0_4 = arith.constant 0 : index
    %c0_5 = arith.constant 0 : index
    %7 = vector.load %arg5[%c0_4, %c0_5] : memref<64x128xf32, #tpu.memory_space<vmem>>, vector<64x128xf32>
    %8 = vector.shape_cast %6 : vector<512x128xf32> to vector<8x64x128xf32>
    %cst = arith.constant dense<0.000000e+00> : vector<64x128xf32>
    %9 = vector.multi_reduction <add>, %8, %cst [0] : vector<8x64x128xf32> to vector<64x128xf32>
    %10 = arith.addf %7, %9 : vector<64x128xf32>
    %c0_6 = arith.constant 0 : index
    %c0_7 = arith.constant 0 : index
    %11 = vector.load %arg5[%c0_6, %c0_7] : memref<64x128xf32, #tpu.memory_space<vmem>>, vector<64x128xf32>
    tpu.vector_store %arg5[%c0_6, %c0_7], %10 {strides = array<i32>} : memref<64x128xf32, #tpu.memory_space<vmem>>, vector<64x128xf32>,
    %c0_i32_8 = arith.constant 0 : i32
    %12 = arith.cmpi eq, %arg1, %c0_i32_8 : i32
    %13 = arith.extui %12 : i1 to i32
    %c0_i32_9 = arith.constant 0 : i32
    %14 = arith.cmpi ne, %13, %c0_i32_9 : i32
    scf.if %14 {
      %c0_10 = arith.constant 0 : index
      %c0_11 = arith.constant 0 : index
      %15 = vector.load %arg5[%c0_10, %c0_11] : memref<64x128xf32, #tpu.memory_space<vmem>>, vector<64x128xf32>
      %16 = vector.shape_cast %15 : vector<64x128xf32> to vector<1x64x128xf32>
      %cst_12 = arith.constant dense<0.000000e+00> : vector<1xf32>
      %17 = vector.multi_reduction <add>, %16, %cst_12 [1, 2] : vector<1x64x128xf32> to vector<1xf32>
      %18 = vector.shape_cast %17 : vector<1xf32> to vector<1x1x1xf32>
      %19 = vector.extract %18[0, 0, 0] : f32 from vector<1x1x1xf32>
      %c0_13 = arith.constant 0 : index
      %c0_14 = arith.constant 0 : index
      %20 = memref.load %arg4[%c0_13, %c0_14] : memref<1x1xf32, #tpu.memory_space<smem>>
      memref.store %19, %arg4[%c0_13, %c0_14] : memref<1x1xf32, #tpu.memory_space<smem>>
    } else {
    }
    return
  }
  func.func @transform_0(%arg0: i32, %arg1: i32) -> (i32, i32) {
    %c1_i32 = arith.constant 1 : i32
    %0 = arith.muli %arg0, %c1_i32 : i32
    %1 = arith.addi %0, %arg1 : i32
    %c0_i32 = arith.constant 0 : i32
    %c0_i32_0 = arith.constant 0 : i32
    return %1, %c0_i32 : i32, i32
  }
  func.func @transform_1(%arg0: i32, %arg1: i32) -> (i32, i32) {
    %c1_i32 = arith.constant 1 : i32
    %0 = arith.muli %arg0, %c1_i32 : i32
    %1 = arith.addi %0, %arg1 : i32
    %c0_i32 = arith.constant 0 : i32
    %c0_i32_0 = arith.constant 0 : i32
    return %1, %c0_i32 : i32, i32
  }
  func.func @transform_2(%arg0: i32, %arg1: i32) -> (i32, i32) {
    %c0_i32 = arith.constant 0 : i32
    %c0_i32_0 = arith.constant 0 : i32
    return %arg0, %c0_i32 : i32, i32
  }
}

</mosaic_0001>

<bundles_post_ra>
// kernel: tpu_custom_call.1
= control target key start
LH: loop header
LB: loop body
LE: loop exit
PB: predicated region body
PF: predicated region fallthrough
CT: control target
= control target key end

     0   :  { %7 = vsyncpa [#allocation4], 0  ;;  %s772_s0 = inlined_call_operand.hbm [shape: f32[512,128], index: 0, kind: input, shape index: {}]   ;;  %s773_s1 = inlined_call_operand.hbm [shape: f32[512,128], index: 1, kind: input, shape index: {}]   ;;  %s774_s2 = inlined_call_operand.hbm [shape: f32[1,1], index: 2, kind: output, shape index: {}]  }
   0x1   :  { %8 = vsyncpa [#allocation7], 0 }
   0x2   :  { %9 = vsyncpa [#allocation5], 0  ;;  %s18_s11 = sshll.u32 %s772_s0, 4  ;;  %s523_s12 = smov [#allocation3]   ;;  %s19_s11 = int_to_ptr.hbm [resolvable:$true] %s18_s11 }
   0x3   :  { %s20_s13 = sshll.u32 %s523_s12, 4  ;;  %s35_s16 = sshll.u32 %s773_s1, 4  ;;  %s21_s13 = int_to_ptr.vmem [resolvable:$true] %s20_s13  ;;  %s36_s16 = int_to_ptr.hbm [resolvable:$true] %s35_s16 }
   0x4   :  { %s524_s17 = smov 128   ;;  %s525_s18 = smov 8  }
   0x5   :  { %26 = dma.hbm_to_vmem [thread:$0]  %s19_s11, 8192, %s21_s13, [#allocation4], %s524_s17, %s524_s17, %s525_s18  }
   0x6   :  { %s526_s19 = smov [#allocation6]  }
   0x7   :  { %s37_s20 = sshll.u32 %s526_s19, 4  ;;  %s38_s20 = int_to_ptr.vmem [resolvable:$true] %s37_s20 }
   0x8   :  { %43 = dma.hbm_to_vmem [thread:$0]  %s36_s16, 8192, %s38_s20, [#allocation7], %s524_s17, %s524_s17, %s525_s18  }
   0x9   :  { %517 = dma.done.wait [#allocation4], 8192  }
   0xa   :  { %518 = vsyncadd [#allocation4], 4294959104 }
   0xb   :  { %519 = dma.done.wait [#allocation7], 8192  }
   0xc   :  { %520 = vsyncadd [#allocation7], 4294959104  ;;  %v68_v0 = vld [vmem:[#allocation3] sm:$0xff]  ;;  %v69_v1 = vld [vmem:[#allocation3 + $0x8] sm:$0xff]  ;;  %s438_s21 = sshll.u32 %s774_s2, 4  ;;  %s527_s23 = smov [#allocation8]   ;;  %s439_s21 = int_to_ptr.hbm [resolvable:$true] %s438_s21 }
   0xd   :  { %v70_v2 = vld [vmem:[#allocation3 + $0x10] sm:$0xff]  ;;  %v71_v3 = vld [vmem:[#allocation3 + $0x18] sm:$0xff]  ;;  %v72_v4 = vld [vmem:[#allocation3 + $0x20] sm:$0xff] }
   0xe   :  { %v73_v5 = vld [vmem:[#allocation3 + $0x28] sm:$0xff]  ;;  %v132_v6 = vld [vmem:[#allocation6] sm:$0xff]  ;;  %v74_v8 = vld [vmem:[#allocation3 + $0x30] sm:$0xff] }
   0xf   :  { %v133_v7 = vld [vmem:[#allocation6 + $0x8] sm:$0xff]  ;;  %v75_v9 = vld [vmem:[#allocation3 + $0x38] sm:$0xff]  ;;  %v76_v10 = vld [vmem:[#allocation3 + $0x40] sm:$0xff]  ;;  %v196_v18 = vsub.f32 %v68_v0, %v132_v6 }
  0x10   :  { %v134_v11 = vld [vmem:[#allocation6 + $0x10] sm:$0xff]  ;;  %v77_v12 = vld [vmem:[#allocation3 + $0x48] sm:$0xff]  ;;  %v79_v14 = vld [vmem:[#allocation3 + $0x58] sm:$0xff]  ;;  %v197_v25 = vsub.f32 %v69_v1, %v133_v7 }
  0x11   :  { %v78_v13 = vld [vmem:[#allocation3 + $0x50] sm:$0xff]  ;;  %v135_v15 = vld [vmem:[#allocation6 + $0x18] sm:$0xff]  ;;  %v136_v16 = vld [vmem:[#allocation6 + $0x20] sm:$0xff]  ;;  %v198_v32 = vsub.f32 %v70_v2, %v134_v11  ;;  %v555_v51 = vmul.f32 %v196_v18, %v196_v18 }
  0x12   :  { %v137_v17 = vld [vmem:[#allocation6 + $0x28] sm:$0xff]  ;;  %v80_v19 = vld [vmem:[#allocation3 + $0x60] sm:$0xff]  ;;  %v82_v21 = vld [vmem:[#allocation3 + $0x70] sm:$0xff]  ;;  %v199_v39 = vsub.f32 %v71_v3, %v135_v15  ;;  %v200_v40 = vsub.f32 %v72_v4, %v136_v16  ;;  %v563_v61 = vmul.f32 %v197_v25, %v197_v25 }
  0x13   :  { %v81_v20 = vld [vmem:[#allocation3 + $0x68] sm:$0xff]  ;;  %v138_v22 = vld [vmem:[#allocation6 + $0x30] sm:$0xff]  ;;  %v139_v23 = vld [vmem:[#allocation6 + $0x38] sm:$0xff]  ;;  %v201_v41 = vsub.f32 %v73_v5, %v137_v17  ;;  %775 = vst [vmem:[#allocation12_spill] sm:$0xff] %v555_v51  ;;  %v571_v7 = vmul.f32 %v198_v32, %v198_v32 }
  0x14   :  { %v140_v24 = vld [vmem:[#allocation6 + $0x40] sm:$0xff]  ;;  %v83_v26 = vld [vmem:[#allocation3 + $0x78] sm:$0xff]  ;;  %v85_v28 = vld [vmem:[#allocation3 + $0x88] sm:$0xff]  ;;  %v549_v48 = vsub.f32 %v74_v8, %v138_v22  ;;  %v551_v49 = vsub.f32 %v75_v9, %v139_v23  ;;  %776 = vst [vmem:[#allocation13_spill] sm:$0xff] %v563_v61  ;;  %v579_v17 = vmul.f32 %v199_v39, %v199_v39 }
  0x15   :  { %v84_v27 = vld [vmem:[#allocation3 + $0x80] sm:$0xff]  ;;  %v141_v29 = vld [vmem:[#allocation6 + $0x48] sm:$0xff]  ;;  %v142_v30 = vld [vmem:[#allocation6 + $0x50] sm:$0xff]  ;;  %v553_v50 = vsub.f32 %v76_v10, %v140_v24  ;;  %777 = vst [vmem:[#allocation14_spill] sm:$0xff] %v571_v7 }
  0x16   :  { %v143_v31 = vld [vmem:[#allocation6 + $0x58] sm:$0xff]  ;;  %v86_v33 = vld [vmem:[#allocation3 + $0x90] sm:$0xff]  ;;  %v88_v35 = vld [vmem:[#allocation3 + $0xa0] sm:$0xff]  ;;  %v557_v58 = vsub.f32 %v77_v12, %v141_v29  ;;  %v559_v59 = vsub.f32 %v78_v13, %v142_v30  ;;  %778 = vst [vmem:[#allocation15_spill] sm:$0xff] %v579_v17 }
  0x17   :  { %v87_v34 = vld [vmem:[#allocation3 + $0x98] sm:$0xff]  ;;  %v144_v36 = vld [vmem:[#allocation6 + $0x60] sm:$0xff]  ;;  %v145_v37 = vld [vmem:[#allocation6 + $0x68] sm:$0xff]  ;;  %v561_v60 = vsub.f32 %v79_v14, %v143_v31 }
  0x18   :  { %v146_v38 = vld [vmem:[#allocation6 + $0x70] sm:$0xff]  ;;  %v89_v42 = vld [vmem:[#allocation3 + $0xa8] sm:$0xff]  ;;  %v91_v44 = vld [vmem:[#allocation3 + $0xb8] sm:$0xff]  ;;  %v565_v4 = vsub.f32 %v80_v19, %v144_v36  ;;  %v567_v5 = vsub.f32 %v81_v20, %v145_v37 }
  0x19   :  { %v90_v43 = vld [vmem:[#allocation3 + $0xb0] sm:$0xff]  ;;  %v147_v45 = vld [vmem:[#allocation6 + $0x78] sm:$0xff]  ;;  %v148_v46 = vld [vmem:[#allocation6 + $0x80] sm:$0xff]  ;;  %v569_v6 = vsub.f32 %v82_v21, %v146_v38 }
  0x1a   :  { %v149_v47 = vld [vmem:[#allocation6 + $0x88] sm:$0xff]  ;;  %v92_v52 = vld [vmem:[#allocation3 + $0xc0] sm:$0xff]  ;;  %v94_v54 = vld [vmem:[#allocation3 + $0xd0] sm:$0xff]  ;;  %v573_v14 = vsub.f32 %v83_v26, %v147_v45  ;;  %v575_v15 = vsub.f32 %v84_v27, %v148_v46  ;;  %v587_v26 = vmul.f32 %v200_v40, %v200_v40 }
  0x1b   :  { %v93_v53 = vld [vmem:[#allocation3 + $0xc8] sm:$0xff]  ;;  %v150_v55 = vld [vmem:[#allocation6 + $0x90] sm:$0xff]  ;;  %v151_v56 = vld [vmem:[#allocation6 + $0x98] sm:$0xff]  ;;  %v577_v16 = vsub.f32 %v85_v28, %v149_v47 }
  0x1c   :  { %v152_v57 = vld [vmem:[#allocation6 + $0xa0] sm:$0xff]  ;;  %v95_v62 = vld [vmem:[#allocation3 + $0xd8] sm:$0xff]  ;;  %v97_v0 = vld [vmem:[#allocation3 + $0xe8] sm:$0xff]  ;;  %v581_v24 = vsub.f32 %v86_v33, %v150_v55  ;;  %v583_v25 = vsub.f32 %v87_v34, %v151_v56  ;;  %779 = vst [vmem:[#allocation16_spill] sm:$0xff] %v587_v26  ;;  %v595_v33 = vmul.f32 %v201_v41, %v201_v41 }
  0x1d   :  { %v96_v63 = vld [vmem:[#allocation3 + $0xe0] sm:$0xff]  ;;  %v153_v1 = vld [vmem:[#allocation6 + $0xa8] sm:$0xff]  ;;  %v154_v2 = vld [vmem:[#allocation6 + $0xb0] sm:$0xff]  ;;  %v585_v29 = vsub.f32 %v88_v35, %v152_v57 }
  0x1e   :  { %v155_v3 = vld [vmem:[#allocation6 + $0xb8] sm:$0xff]  ;;  %v98_v8 = vld [vmem:[#allocation3 + $0xf0] sm:$0xff]  ;;  %v100_v10 = vld [vmem:[#allocation3 + $0x100] sm:$0xff]  ;;  %v589_v37 = vsub.f32 %v89_v42, %v153_v1  ;;  %v591_v38 = vsub.f32 %v90_v43, %v154_v2  ;;  %780 = vst [vmem:[#allocation17_spill] sm:$0xff] %v595_v33  ;;  %v605_v42 = vmul.f32 %v549_v48, %v549_v48 }
  0x1f   :  { %v99_v9 = vld [vmem:[#allocation3 + $0xf8] sm:$0xff]  ;;  %v156_v11 = vld [vmem:[#allocation6 + $0xc0] sm:$0xff]  ;;  %v157_v12 = vld [vmem:[#allocation6 + $0xc8] sm:$0xff]  ;;  %v593_v39 = vsub.f32 %v91_v44, %v155_v3 }
  0x20   :  { %v158_v13 = vld [vmem:[#allocation6 + $0xd0] sm:$0xff]  ;;  %v101_v18 = vld [vmem:[#allocation3 + $0x108] sm:$0xff]  ;;  %v103_v20 = vld [vmem:[#allocation3 + $0x118] sm:$0xff]  ;;  %v597_v55 = vsub.f32 %v92_v52, %v156_v11  ;;  %v599_v56 = vsub.f32 %v93_v53, %v157_v12  ;;  %781 = vst [vmem:[#allocation18_spill] sm:$0xff] %v605_v42  ;;  %v615_v53 = vmul.f32 %v551_v49, %v551_v49 }
  0x21   :  { %v102_v19 = vld [vmem:[#allocation3 + $0x110] sm:$0xff]  ;;  %v159_v21 = vld [vmem:[#allocation6 + $0xd8] sm:$0xff]  ;;  %v160_v22 = vld [vmem:[#allocation6 + $0xe0] sm:$0xff]  ;;  %v601_v57 = vsub.f32 %v94_v54, %v158_v13 }
  0x22   :  { %v161_v23 = vld [vmem:[#allocation6 + $0xe8] sm:$0xff]  ;;  %v104_v27 = vld [vmem:[#allocation3 + $0x120] sm:$0xff]  ;;  %v106_v28 = vld [vmem:[#allocation3 + $0x130] sm:$0xff]  ;;  %v607_v33 = vsub.f32 %v95_v62, %v159_v21  ;;  %v609_v26 = vsub.f32 %v96_v63, %v160_v22  ;;  %782 = vst [vmem:[#allocation19_spill] sm:$0xff] %v615_v53  ;;  %v625_v63 = vmul.f32 %v553_v50, %v553_v50 }
  0x23   :  { %v105_v30 = vld [vmem:[#allocation3 + $0x128] sm:$0xff]  ;;  %v162_v31 = vld [vmem:[#allocation6 + $0xf0] sm:$0xff]  ;;  %v163_v32 = vld [vmem:[#allocation6 + $0xf8] sm:$0xff]  ;;  %v611_v52 = vsub.f32 %v97_v0, %v161_v23 }
  0x24   :  { %v164_v36 = vld [vmem:[#allocation6 + $0x100] sm:$0xff]  ;;  %v107_v34 = vld [vmem:[#allocation3 + $0x138] sm:$0xff]  ;;  %v109_v35 = vld [vmem:[#allocation3 + $0x148] sm:$0xff]  ;;  %v617_v17 = vsub.f32 %v98_v8, %v162_v31  ;;  %v619_v7 = vsub.f32 %v99_v9, %v163_v32  ;;  %785 = vst [vmem:[#allocation22_spill] sm:$0xff] %v625_v63  ;;  %v635_v9 = vmul.f32 %v557_v58, %v557_v58 }
  0x25   :  { %v108_v45 = vld [vmem:[#allocation3 + $0x140] sm:$0xff]  ;;  %v165_v46 = vld [vmem:[#allocation6 + $0x108] sm:$0xff]  ;;  %v166_v40 = vld [vmem:[#allocation6 + $0x110] sm:$0xff]  ;;  %v621_v62 = vsub.f32 %v100_v10, %v164_v36 }
  0x26   :  { %v167_v47 = vld [vmem:[#allocation6 + $0x118] sm:$0xff]  ;;  %v110_v43 = vld [vmem:[#allocation3 + $0x150] sm:$0xff]  ;;  %v112_v41 = vld [vmem:[#allocation3 + $0x160] sm:$0xff]  ;;  %783 = vst [vmem:[#allocation20_spill] sm:$0xff] %v619_v7  ;;  %v627_v61 = vsub.f32 %v101_v18, %v165_v46  ;;  %v629_v51 = vsub.f32 %v102_v19, %v166_v40  ;;  %v645_v19 = vmul.f32 %v559_v59, %v559_v59 }
  0x27   :  { %v111_v44 = vld [vmem:[#allocation3 + $0x158] sm:$0xff]  ;;  %v168_v1 = vld [vmem:[#allocation6 + $0x120] sm:$0xff]  ;;  %v169_v2 = vld [vmem:[#allocation6 + $0x128] sm:$0xff]  ;;  %784 = vst [vmem:[#allocation21_spill] sm:$0xff] %v621_v62  ;;  %v631_v8 = vsub.f32 %v103_v20, %v167_v47 }
  0x28   :  { %v170_v3 = vld [vmem:[#allocation6 + $0x130] sm:$0xff]  ;;  %v113_v54 = vld [vmem:[#allocation3 + $0x168] sm:$0xff]  ;;  %v115_v48 = vld [vmem:[#allocation3 + $0x178] sm:$0xff]  ;;  %786 = vst [vmem:[#allocation23_spill] sm:$0xff] %v627_v61  ;;  %v637_v62 = vsub.f32 %v104_v27, %v168_v1  ;;  %v639_v7 = vsub.f32 %v105_v30, %v169_v2  ;;  %v655_v30 = vmul.f32 %v561_v60, %v561_v60 }
  0x29   :  { %v114_v11 = vld [vmem:[#allocation3 + $0x170] sm:$0xff]  ;;  %v171_v12 = vld [vmem:[#allocation6 + $0x138] sm:$0xff]  ;;  %v172_v13 = vld [vmem:[#allocation6 + $0x140] sm:$0xff]  ;;  %787 = vst [vmem:[#allocation24_spill] sm:$0xff] %v629_v51  ;;  %v641_v18 = vsub.f32 %v106_v28, %v170_v3 }
  0x2a   :  { %v173_v42 = vld [vmem:[#allocation6 + $0x148] sm:$0xff]  ;;  %v116_v0 = vld [vmem:[#allocation3 + $0x180] sm:$0xff]  ;;  %v118_v49 = vld [vmem:[#allocation3 + $0x190] sm:$0xff]  ;;  %788 = vst [vmem:[#allocation25_spill] sm:$0xff] %v631_v8  ;;  %v647_v8 = vsub.f32 %v107_v34, %v171_v12  ;;  %v649_v51 = vsub.f32 %v108_v45, %v172_v13  ;;  %v659_v34 = vmul.f32 %v565_v4, %v565_v4  ;;  %v274_v4 = vmul.f32 %v569_v6, %v569_v6 }
  0x2b   :  { %v117_v21 = vld [vmem:[#allocation3 + $0x188] sm:$0xff]  ;;  %v174_v22 = vld [vmem:[#allocation6 + $0x150] sm:$0xff]  ;;  %v175_v23 = vld [vmem:[#allocation6 + $0x158] sm:$0xff]  ;;  %789 = vst [vmem:[#allocation26_spill] sm:$0xff] %v635_v9  ;;  %v651_v27 = vsub.f32 %v109_v35, %v173_v42 }
  0x2c   :  { %v176_v53 = vld [vmem:[#allocation6 + $0x160] sm:$0xff]  ;;  %v119_v10 = vld [vmem:[#allocation3 + $0x198] sm:$0xff]  ;;  %v121_v50 = vld [vmem:[#allocation3 + $0x1a8] sm:$0xff]  ;;  %790 = vst [vmem:[#allocation27_spill] sm:$0xff] %v637_v62 }
  0x2d   :  { %v120_v31 = vld [vmem:[#allocation3 + $0x1a0] sm:$0xff]  ;;  %v177_v32 = vld [vmem:[#allocation6 + $0x168] sm:$0xff]  ;;  %v178_v36 = vld [vmem:[#allocation6 + $0x170] sm:$0xff]  ;;  %791 = vst [vmem:[#allocation28_spill] sm:$0xff] %v639_v7  ;;  %v239_v7 = vsub.f32 %v111_v44, %v175_v23  ;;  %v240_v62 = vsub.f32 %v112_v41, %v176_v53 }
  0x2e   :  { %v179_v63 = vld [vmem:[#allocation6 + $0x178] sm:$0xff]  ;;  %792 = vst [vmem:[#allocation29_spill] sm:$0xff] %v641_v18  ;;  %v122_v20 = vld [vmem:[#allocation3 + $0x1b0] sm:$0xff]  ;;  %v124_v58 = vld [vmem:[#allocation3 + $0x1c0] sm:$0xff]  ;;  %v238_v18 = vsub.f32 %v110_v43, %v174_v22  ;;  %v241_v13 = vsub.f32 %v113_v54, %v177_v32  ;;  %v242_v60 = vsub.f32 %v114_v11, %v178_v36  ;;  %v279_v32 = vmul.f32 %v583_v25, %v583_v25 }
  0x2f   :  { %793 = vst [vmem:[#allocation30_spill] sm:$0xff] %v645_v19  ;;  %v123_v46 = vld [vmem:[#allocation3 + $0x1b8] sm:$0xff]  ;;  %v180_v40 = vld [vmem:[#allocation6 + $0x180] sm:$0xff]  ;;  %v181_v47 = vld [vmem:[#allocation6 + $0x188] sm:$0xff]  ;;  %v284_v36 = vmul.f32 %v597_v55, %v597_v55  ;;  %v286_v25 = vmul.f32 %v601_v57, %v601_v57 }
  0x30   :  { %v182_v9 = vld [vmem:[#allocation6 + $0x190] sm:$0xff]  ;;  %794 = vst [vmem:[#allocation31_spill] sm:$0xff] %v647_v8  ;;  %v125_v28 = vld [vmem:[#allocation3 + $0x1c8] sm:$0xff]  ;;  %v127_v59 = vld [vmem:[#allocation3 + $0x1d8] sm:$0xff]  ;;  %v244_v44 = vsub.f32 %v116_v0, %v180_v40  ;;  %v245_v41 = vsub.f32 %v117_v21, %v181_v47  ;;  %v276_v21 = vmul.f32 %v575_v15, %v575_v15  ;;  %v281_v15 = vmul.f32 %v589_v37, %v589_v37 }
  0x31   :  { %795 = vst [vmem:[#allocation32_spill] sm:$0xff] %v649_v51  ;;  %v126_v1 = vld [vmem:[#allocation3 + $0x1d0] sm:$0xff]  ;;  %v183_v2 = vld [vmem:[#allocation6 + $0x198] sm:$0xff]  ;;  %v184_v3 = vld [vmem:[#allocation6 + $0x1a0] sm:$0xff]  ;;  %v246_v53 = vsub.f32 %v118_v49, %v182_v9  ;;  %v288_v37 = vmul.f32 %v609_v26, %v609_v26 }
  0x32   :  { %796 = vst [vmem:[#allocation33_spill] sm:$0xff] %v651_v27  ;;  %v185_v19 = vld [vmem:[#allocation6 + $0x1a8] sm:$0xff]  ;;  %v128_v45 = vld [vmem:[#allocation3 + $0x1e0] sm:$0xff]  ;;  %v186_v35 = vld [vmem:[#allocation6 + $0x1b0] sm:$0xff]  ;;  %v663_v27 = vmul.f32 %v567_v5, %v567_v5  ;;  %v247_v61 = vsub.f32 %v119_v10, %v183_v2  ;;  %v248_v54 = vsub.f32 %v120_v31, %v184_v3  ;;  %v275_v5 = vmul.f32 %v573_v14, %v573_v14 }
  0x33   :  { %797 = vst [vmem:[#allocation34_spill] sm:$0xff] %v655_v30  ;;  %v187_v42 = vld [vmem:[#allocation6 + $0x1b8] sm:$0xff]  ;;  %v188_v12 = vld [vmem:[#allocation6 + $0x1c0] sm:$0xff]  ;;  %v243_v30 = vsub.f32 %v115_v48, %v179_v63  ;;  %v189_v51 = vld [vmem:[#allocation6 + $0x1c8] sm:$0xff]  ;;  %v667_v11 = vsub.f32 %v121_v50, %v185_v19  ;;  %v671_v48 = vsub.f32 %v122_v20, %v186_v35  ;;  %v277_v10 = vmul.f32 %v577_v16, %v577_v16 }
  0x34   :  { %798 = vst [vmem:[#allocation35_spill] sm:$0xff] %v659_v34  ;;  %v190_v8 = vld [vmem:[#allocation6 + $0x1d0] sm:$0xff]  ;;  %v191_v43 = vld [vmem:[#allocation6 + $0x1d8] sm:$0xff]  ;;  %v129_v22 = vld [vmem:[#allocation3 + $0x1e8] sm:$0xff]  ;;  %v673_v63 = vsub.f32 %v123_v46, %v187_v42  ;;  %v252_v0 = vsub.f32 %v124_v58, %v188_v12  ;;  %v253_v49 = vsub.f32 %v125_v28, %v189_v51  ;;  %v278_v14 = vmul.f32 %v581_v24, %v581_v24 }
  0x35   :  { %v192_v23 = vld [vmem:[#allocation6 + $0x1e0] sm:$0xff]  ;;  %v193_v34 = vld [vmem:[#allocation6 + $0x1e8] sm:$0xff]  ;;  %799 = vst [vmem:[#allocation36_spill] sm:$0xff] %v667_v11  ;;  %v677_v6 = vsub.f32 %v126_v1, %v190_v8  ;;  %v679_v9 = vsub.f32 %v127_v59, %v191_v43  ;;  %v280_v51 = vmul.f32 %v585_v29, %v585_v29  ;;  %v282_v8 = vmul.f32 %v591_v38, %v591_v38  ;;  %v808_v46 = vld [vmem:[#allocation23_spill] sm:$0xff] }
  0x36   :  { %800 = vst [vmem:[#allocation37_spill] sm:$0xff] %v671_v48  ;;  %v683_v31 = vsub.f32 %v128_v45, %v192_v23  ;;  %v685_v50 = vsub.f32 %v129_v22, %v193_v34  ;;  %v283_v16 = vmul.f32 %v593_v39, %v593_v39  ;;  %v285_v24 = vmul.f32 %v599_v56, %v599_v56  ;;  %v806_v19 = vld [vmem:[#allocation20_spill] sm:$0xff]  ;;  %v807_v20 = vld [vmem:[#allocation21_spill] sm:$0xff]  ;;  %v811_v47 = vld [vmem:[#allocation27_spill] sm:$0xff] }
  0x37   :  { %801 = vst [vmem:[#allocation38_spill] sm:$0xff] %v673_v63  ;;  %v287_v29 = vmul.f32 %v607_v33, %v607_v33  ;;  %v289_v38 = vmul.f32 %v611_v52, %v611_v52  ;;  %v290_v39 = vmul.f32 %v617_v17, %v617_v17  ;;  %v291_v55 = vmul.f32 %v806_v19, %v806_v19  ;;  %v809_v58 = vld [vmem:[#allocation24_spill] sm:$0xff]  ;;  %v810_v40 = vld [vmem:[#allocation25_spill] sm:$0xff]  ;;  %v814_v2 = vld [vmem:[#allocation31_spill] sm:$0xff] }
  0x38   :  { %802 = vst [vmem:[#allocation39_spill] sm:$0xff] %v677_v6  ;;  %v292_v56 = vmul.f32 %v807_v20, %v807_v20  ;;  %v293_v57 = vmul.f32 %v808_v46, %v808_v46  ;;  %v294_v33 = vmul.f32 %v809_v58, %v809_v58  ;;  %v295_v26 = vmul.f32 %v810_v40, %v810_v40  ;;  %v812_v28 = vld [vmem:[#allocation28_spill] sm:$0xff]  ;;  %v813_v1 = vld [vmem:[#allocation29_spill] sm:$0xff]  ;;  %v831_v48 = vld [vmem:[#allocation19_spill] sm:$0xff] }
  0x39   :  { %803 = vst [vmem:[#allocation40_spill] sm:$0xff] %v679_v9  ;;  %v296_v52 = vmul.f32 %v811_v47, %v811_v47  ;;  %v297_v17 = vmul.f32 %v812_v28, %v812_v28  ;;  %v298_v59 = vmul.f32 %v813_v1, %v813_v1  ;;  %v299_v3 = vmul.f32 %v814_v2, %v814_v2  ;;  %v815_v34 = vld [vmem:[#allocation32_spill] sm:$0xff]  ;;  %v816_v35 = vld [vmem:[#allocation33_spill] sm:$0xff] }
  0x3a   :  { %804 = vst [vmem:[#allocation41_spill] sm:$0xff] %v683_v31  ;;  %v300_v45 = vmul.f32 %v815_v34, %v815_v34  ;;  %v301_v42 = vmul.f32 %v816_v35, %v816_v35  ;;  %v302_v12 = vmul.f32 %v238_v18, %v238_v18  ;;  %v303_v43 = vmul.f32 %v239_v7, %v239_v7  ;;  %v820_v34 = vld [vmem:[#allocation22_spill] sm:$0xff]  ;;  %v821_v31 = vld [vmem:[#allocation13_spill] sm:$0xff] }
  0x3b   :  { %805 = vst [vmem:[#allocation42_spill] sm:$0xff] %v685_v50  ;;  %v304_v22 = vmul.f32 %v240_v62, %v240_v62  ;;  %v305_v23 = vmul.f32 %v241_v13, %v241_v13  ;;  %v735_v19 = vmul.f32 %v242_v60, %v242_v60  ;;  %v737_v20 = vmul.f32 %v243_v30, %v243_v30  ;;  %v819_v50 = vld [vmem:[#allocation12_spill] sm:$0xff]  ;;  %v822_v35 = vld [vmem:[#allocation26_spill] sm:$0xff]  ;;  %v825_v60 = vld [vmem:[#allocation15_spill] sm:$0xff] }
  0x3c   :  { %v308_v46 = vmul.f32 %v244_v44, %v244_v44  ;;  %v309_v58 = vmul.f32 %v245_v41, %v245_v41  ;;  %v310_v40 = vmul.f32 %v246_v53, %v246_v53  ;;  %v311_v47 = vmul.f32 %v247_v61, %v247_v61  ;;  %v823_v7 = vld [vmem:[#allocation14_spill] sm:$0xff]  ;;  %v828_v44 = vld [vmem:[#allocation35_spill] sm:$0xff]  ;;  %v829_v61 = vld [vmem:[#allocation17_spill] sm:$0xff] }
  0x3d   :  { %817 = vst [vmem:[#allocation20_spill] sm:$0xff] %v735_v19  ;;  %v312_v28 = vmul.f32 %v248_v54, %v248_v54  ;;  %v316_v1 = vmul.f32 %v252_v0, %v252_v0  ;;  %v317_v2 = vmul.f32 %v253_v49, %v253_v49  ;;  %v332_v63 = vadd.f32 %v820_v34, %v819_v50  ;;  %v824_v62 = vld [vmem:[#allocation30_spill] sm:$0xff] }
  0x3e   :  { %818 = vst [vmem:[#allocation21_spill] sm:$0xff] %v737_v20  ;;  %v339_v18 = vadd.f32 %v822_v35, %v821_v31  ;;  %v346_v13 = vadd.f32 %v824_v62, %v823_v7  ;;  %v826_v19 = vld [vmem:[#allocation34_spill] sm:$0xff]  ;;  %v827_v20 = vld [vmem:[#allocation16_spill] sm:$0xff]  ;;  %v367_v54 = vadd.f32 %v663_v27, %v829_v61  ;;  %v381_v50 = vadd.f32 %v275_v5, %v831_v48 }
  0x3f   :  { %v353_v30 = vadd.f32 %v826_v19, %v825_v60  ;;  %v360_v41 = vadd.f32 %v828_v44, %v827_v20  ;;  %v333_v53 = vadd.f32 %v332_v63, %v276_v21  ;;  %v830_v0 = vld [vmem:[#allocation18_spill] sm:$0xff] }
  0x40   :  { %v374_v49 = vadd.f32 %v274_v4, %v830_v0  ;;  %v340_v34 = vadd.f32 %v339_v18, %v277_v10  ;;  %v347_v9 = vadd.f32 %v346_v13, %v278_v14  ;;  %v368_v7 = vadd.f32 %v367_v54, %v281_v15  ;;  %v832_v10 = vld [vmem:[#allocation39_spill] sm:$0xff] }
  0x41   :  { %v354_v31 = vadd.f32 %v353_v30, %v279_v32  ;;  %v361_v35 = vadd.f32 %v360_v41, %v280_v51  ;;  %v334_v11 = vadd.f32 %v333_v53, %v284_v36  ;;  %v382_v6 = vadd.f32 %v381_v50, %v283_v16  ;;  %v194_v16 = vld [vmem:[#allocation6 + $0x1f0] sm:$0xff] }
  0x42   :  { %v375_v62 = vadd.f32 %v374_v49, %v282_v8  ;;  %v341_v19 = vadd.f32 %v340_v34, %v285_v24  ;;  %v348_v60 = vadd.f32 %v347_v9, %v286_v25  ;;  %v369_v21 = vadd.f32 %v368_v7, %v289_v38  ;;  %v130_v8 = vld [vmem:[#allocation3 + $0x1f0] sm:$0xff] }
  0x43   :  { %v355_v20 = vadd.f32 %v354_v31, %v287_v29  ;;  %v362_v44 = vadd.f32 %v361_v35, %v288_v37  ;;  %v335_v63 = vadd.f32 %v334_v11, %v292_v56  ;;  %v383_v61 = vadd.f32 %v382_v6, %v291_v55  ;;  %v833_v11 = vld [vmem:[#allocation36_spill] sm:$0xff]  ;;  %v131_v55 = vld [vmem:[#allocation3 + $0x1f8] sm:$0xff]  ;;  %v838_v41 = vld [vmem:[#allocation38_spill] sm:$0xff] }
  0x44   :  { %v376_v27 = vadd.f32 %v375_v62, %v290_v39  ;;  %v342_v0 = vadd.f32 %v341_v19, %v293_v57  ;;  %v349_v4 = vadd.f32 %v348_v60, %v294_v33  ;;  %v318_v14 = vmul.f32 %v832_v10, %v832_v10  ;;  %v834_v6 = vld [vmem:[#allocation40_spill] sm:$0xff]  ;;  %v195_v56 = vld [vmem:[#allocation6 + $0x1f8] sm:$0xff] }
  0x45   :  { %v356_v5 = vadd.f32 %v355_v20, %v295_v26  ;;  %v363_v48 = vadd.f32 %v362_v44, %v296_v52  ;;  %v336_v32 = vadd.f32 %v335_v63, %v300_v45  ;;  %v370_v51 = vadd.f32 %v369_v21, %v297_v17  ;;  %v837_v30 = vld [vmem:[#allocation20_spill] sm:$0xff]  ;;  %v840_v54 = vld [vmem:[#allocation21_spill] sm:$0xff] }
  0x46   :  { %v377_v15 = vadd.f32 %v376_v27, %v298_v59  ;;  %v343_v36 = vadd.f32 %v342_v0, %v301_v42  ;;  %v350_v9 = vadd.f32 %v349_v4, %v302_v12  ;;  %v313_v29 = vmul.f32 %v833_v11, %v833_v11  ;;  %v835_v59 = vld [vmem:[#allocation37_spill] sm:$0xff] }
  0x47   :  { %v357_v24 = vadd.f32 %v356_v5, %v303_v43  ;;  %v364_v25 = vadd.f32 %v363_v48, %v304_v22  ;;  %v319_v37 = vmul.f32 %v834_v6, %v834_v6  ;;  %v337_v38 = vadd.f32 %v336_v32, %v308_v46  ;;  %v836_v42 = vld [vmem:[#allocation41_spill] sm:$0xff] }
  0x48   :  { %v384_v39 = vadd.f32 %v383_v61, %v299_v3  ;;  %v344_v57 = vadd.f32 %v343_v36, %v309_v58  ;;  %v351_v33 = vadd.f32 %v350_v9, %v310_v40  ;;  %v371_v52 = vadd.f32 %v370_v51, %v305_v23  ;;  %v839_v40 = vld [vmem:[#allocation42_spill] sm:$0xff] }
  0x49   :  { %v358_v26 = vadd.f32 %v357_v24, %v311_v47  ;;  %v258_v17 = vsub.f32 %v130_v8, %v194_v16  ;;  %v314_v45 = vmul.f32 %v835_v59, %v835_v59  ;;  %v320_v12 = vmul.f32 %v836_v42, %v836_v42 }
  0x4a   :  { %v338_v43 = vadd.f32 %v337_v38, %v316_v1  ;;  %v345_v22 = vadd.f32 %v344_v57, %v317_v2  ;;  %v352_v18 = vadd.f32 %v351_v33, %v318_v14  ;;  %v365_v13 = vadd.f32 %v364_v25, %v312_v28 }
  0x4b   :  { %v378_v46 = vadd.f32 %v377_v15, %v837_v30  ;;  %v259_v3 = vsub.f32 %v131_v55, %v195_v56  ;;  %v315_v58 = vmul.f32 %v838_v41, %v838_v41  ;;  %v321_v23 = vmul.f32 %v839_v40, %v839_v40 }
  0x4c   :  { %v359_v47 = vadd.f32 %v358_v26, %v319_v37  ;;  %v372_v53 = vadd.f32 %v371_v52, %v313_v29  ;;  %v385_v49 = vadd.f32 %v384_v39, %v840_v54  ;;  %v415_v50 = vadd.f32 %v345_v22, %v338_v43 }
  0x4d   :  { %v322_v34 = vmul.f32 %v258_v17, %v258_v17  ;;  %v366_v31 = vadd.f32 %v365_v13, %v320_v12  ;;  %v379_v1 = vadd.f32 %v378_v46, %v314_v45  ;;  %v323_v35 = vmul.f32 %v259_v3, %v259_v3 }
  0x4e   :  { %v416_v2 = vadd.f32 %v415_v50, %v352_v18  ;;  %v373_v28 = vadd.f32 %v372_v53, %v321_v23  ;;  %v386_v7 = vadd.f32 %v385_v49, %v315_v58 }
  0x4f   :  { %v380_v19 = vadd.f32 %v379_v1, %v322_v34 }
  0x50   :  { %v417_v62 = vadd.f32 %v416_v2, %v359_v47  ;;  %v387_v20 = vadd.f32 %v386_v7, %v323_v35 }
  0x52   :  { %v418_v60 = vadd.f32 %v417_v62, %v366_v31 }
  0x54   :  { %v419_v44 = vadd.f32 %v418_v60, %v373_v28 }
  0x56   :  { %v420_v63 = vadd.f32 %v419_v44, %v380_v19 }
  0x58   :  { %v421_v21 = vadd.f32 %v420_v63, %v387_v20 }
  0x5a   :  { %422 = vadd.xlane.f32.xlu0 %v421_v21 }
  0xcd   :  { %v423_v27 = vpop.xlane.xlu0 %422 }
  0xce   :  { %v424_v61 = vrot.slane %v423_v27, 4 }
  0xd0   :  { %v425_v0 = vadd.f32 %v424_v61, %v423_v27 }
  0xd2   :  { %v426_v4 = vrot.slane %v425_v0, 2 }
  0xd4   :  { %v427_v5 = vadd.f32 %v426_v4, %v425_v0 }
  0xd6   :  { %v428_v48 = vrot.slane %v427_v5, 1 }
  0xd8   :  { %v429_v10 = vadd.f32 %v428_v48, %v427_v5 }
  0xda   :  { %450 = vpush %v429_v10 }
 0x10b   :  { %s451_s22 = spop %450 }
 0x10c   :  { %432 = sst [smem:[#allocation8]] %s451_s22 }
 0x10d   :  { %441 = dma.smem_to_hbm %s527_s23, 16, %s439_s21, [#allocation5]  }
 0x10e   :  { %521 = dma.done.wait [#allocation5], 16  }
 0x10f   :  { %522 = vsyncadd [#allocation5], 4294967280 }
 0x110   :  { %446 = sfence }
 0x111   :  { %447 = vsyncpa [#allocation4], 1 }
 0x112   :  { %448 = vsyncpa [#allocation7], 1 }
 0x113   :  { %449 = vsyncpa [#allocation5], 1 }

</bundles_post_ra>
